<compile_context>
chip_gen: v7x
topology: tpu7x:2x2x1
jax: 0.10.0
libtpu: 0.0.40
codegen_flags: <defaults>
</compile_context>

<pallas_src>
import jax
import jax.numpy as jnp
from jax.experimental import pallas as pl
from jax.experimental.pallas import tpu as pltpu


def _ratio_estimator_kernel(x_ref, w1_ref, b1_ref, w2_ref, b2_ref,
                            w3_ref, b3_ref, out_ref):
    """Fused MLP log-ratio estimator for one (TILE_B, D) batch tile.

    Writes a lane-dense (2, TILE_B) block: row 0 = d, row 1 = log_ratio.
    """
    x = x_ref[...].astype(jnp.bfloat16)                               # (TB, D)
    h1 = jnp.dot(x, w1_ref[...],
                 preferred_element_type=jnp.float32) + b1_ref[...]    # (TB, H)
    h1 = jnp.maximum(h1, 0.0)
    h2 = jnp.dot(h1.astype(jnp.bfloat16), w2_ref[...],
                 preferred_element_type=jnp.float32) + b2_ref[...]    # (TB, H)
    h2 = jnp.maximum(h2, 0.0)
    # Head (H -> 1) in transposed orientation so the result is lane-dense in
    # the batch dim: (1, H) . (TB, H)^T -> (1, TB).  Same pattern as the
    # q @ k^T flash contraction; tiny M=1 matmul, f32 accumulation.
    logr = jax.lax.dot_general(
        w3_ref[...], h2,
        dimension_numbers=(((1,), (1,)), ((), ())),
        preferred_element_type=jnp.float32) + b3_ref[...]             # (1, TB)
    # Numerically safe sigmoid via tanh (EUP slot; no exp overflow).
    d = 0.5 * (jnp.tanh(0.5 * logr) + 1.0)
    # Single combined lane-dense store.
    out_ref[...] = jnp.concatenate([d, logr], axis=0)                 # (2, TB)


def _round_up(x, m):
    return ((x + m - 1) // m) * m


def _choose_tile_b(batch, requested):
    """Pick the streaming batch tile.

    Multiple of 128 (lane-dense output block), never bigger than the padded
    batch, capped at 4096 (v7x 64 MiB VMEM / 32 MiB scoped default), and
    halved when possible so the grid keeps >=2 steps (v7x: 2 TensorCores
    sharded over the "parallel" grid axis).
    """
    requested = min(max(int(requested), 128), 4096)
    b_ceil = _round_up(max(int(batch), 1), 128)
    tile = min(_round_up(requested, 128), b_ceil)
    if b_ceil > 128:
        tile = min(tile, _round_up(-(-b_ceil // 2), 128))
    return max(tile, 128)


def ratio_estimator_forward(xs, params, *, tile_b=2048):
    """Returns (d, log_ratio), each (B, 1) f32, with d = sigmoid(log_ratio).

    xs: (B, D).  Stream xs as bf16 from the producer when possible (it is the
    only large HBM stream); the kernel casts to bf16 internally either way —
    no standalone cast pass is added in this wrapper.
    """
    w1, b1, w2, b2, w3_row, b3 = params
    B, D = xs.shape
    H = w1.shape[1]

    tile_b = _choose_tile_b(B, tile_b)
    grid_b = pl.cdiv(B, tile_b)
    b_out = grid_b * tile_b          # lane-padded output width (sliced below)

    def resident(shape):
        # Block index constant across grid steps -> stays VMEM-resident.
        return pl.BlockSpec(shape, lambda i: (0, 0))

    packed = pl.pallas_call(
        _ratio_estimator_kernel,
        out_shape=jax.ShapeDtypeStruct((2, b_out), jnp.float32),
        grid=(grid_b,),
        in_specs=[
            pl.BlockSpec((tile_b, D), lambda i: (i, 0)),  # streamed batch tile
            resident((D, H)),                             # w1 (bf16)
            resident((1, H)),                             # b1 (f32)
            resident((H, H)),                             # w2 (bf16)
            resident((1, H)),                             # b2 (f32)
            resident((1, H)),                             # w3 row (f32)
            resident((1, 1)),                             # b3 (f32)
        ],
        out_specs=pl.BlockSpec((2, tile_b), lambda i: (0, i)),  # lane-dense
        compiler_params=pltpu.CompilerParams(
            dimension_semantics=("parallel",),
        ),
    )(xs, w1, b1, w2, b2, w3_row, b3)

    d = packed[0, :B].reshape(B, 1)
    log_ratio = packed[1, :B].reshape(B, 1)
    return d, log_ratio


def init_params(key, d_in=32, hidden=128):
    """Synthetic concrete-estimator parameters (Glorot-ish scaling).

    w1/w2 are stored in bf16 (native MXU input dtype); the head row w3 and all
    biases stay f32 (elementwise / head math is kept in f32).  hidden defaults
    to 128 so the minor dims are lane-aligned (no (8,128) padding waste).
    """
    k1, k2, k3, kb1, kb2, kb3 = jax.random.split(key, 6)
    w1 = (jax.random.normal(k1, (d_in, hidden), jnp.float32)
          * (1.0 / jnp.sqrt(d_in))).astype(jnp.bfloat16)
    b1 = 0.05 * jax.random.normal(kb1, (1, hidden), jnp.float32)
    w2 = (jax.random.normal(k2, (hidden, hidden), jnp.float32)
          * (1.0 / jnp.sqrt(hidden))).astype(jnp.bfloat16)
    b2 = 0.05 * jax.random.normal(kb2, (1, hidden), jnp.float32)
    w3_row = (jax.random.normal(k3, (1, hidden), jnp.float32)
              * (1.0 / jnp.sqrt(hidden)))
    b3 = 0.05 * jax.random.normal(kb3, (1, 1), jnp.float32)
    return (w1, b1, w2, b2, w3_row, b3)


def _reference_forward(xs, params):
    """Pure-JAX reference mirroring the kernel's dtype path."""
    w1, b1, w2, b2, w3_row, b3 = params
    x = xs.astype(jnp.bfloat16)
    h1 = jnp.maximum(jnp.dot(x, w1,
                             preferred_element_type=jnp.float32) + b1, 0.0)
    h2 = jnp.maximum(jnp.dot(h1.astype(jnp.bfloat16), w2,
                             preferred_element_type=jnp.float32) + b2, 0.0)
    logr = jnp.dot(h2, w3_row.T, preferred_element_type=jnp.float32) + b3
    d = 0.5 * (jnp.tanh(0.5 * logr) + 1.0)
    return d, logr


if __name__ == "__main__":
    key = jax.random.PRNGKey(0)
    k_p, k_x1, k_x2 = jax.random.split(key, 3)

    D, H = 32, 128
    params = init_params(k_p, D, H)

    # Small case: B=16 -> single grid step, ragged (partial) batch block.
    # xs produced directly in bf16 (producer-side), so the HBM stream is bf16.
    xs1 = jax.random.normal(k_x1, (16, D), jnp.bfloat16)
    d1, logr1 = ratio_estimator_forward(xs1, params)
    jax.block_until_ready((d1, logr1))
    d1_ref, logr1_ref = _reference_forward(xs1, params)
    assert d1.shape == (16, 1) and logr1.shape == (16, 1)
    assert jnp.allclose(logr1, logr1_ref, atol=1e-3, rtol=1e-3)
    assert jnp.allclose(d1, d1_ref, atol=1e-3, rtol=1e-3)

    # Multi-tile case: B=300 -> tile_b=256, grid=(2,), ragged last block
    # (44 valid rows), no wrapper padding of xs.
    xs2 = jax.random.normal(k_x2, (300, D), jnp.bfloat16)
    d2, logr2 = ratio_estimator_forward(xs2, params)
    jax.block_until_ready((d2, logr2))
    d2_ref, logr2_ref = _reference_forward(xs2, params)
    assert d2.shape == (300, 1) and logr2.shape == (300, 1)
    assert jnp.allclose(logr2, logr2_ref, atol=1e-3, rtol=1e-3)
    assert jnp.allclose(d2, d2_ref, atol=1e-3, rtol=1e-3)

    print("KERNEL_OK")
</pallas_src>

<mosaic_0001>
module attributes {stable_mosaic.version = 11 : i64} {
  func.func @_ratio_estimator_kernel(%arg0: i32, %arg1: memref<128x32xbf16, #tpu.memory_space<vmem>>, %arg2: memref<32x128xbf16, #tpu.memory_space<vmem>>, %arg3: memref<1x128xf32, #tpu.memory_space<vmem>>, %arg4: memref<128x128xbf16, #tpu.memory_space<vmem>>, %arg5: memref<1x128xf32, #tpu.memory_space<vmem>>, %arg6: memref<1x128xf32, #tpu.memory_space<vmem>>, %arg7: memref<1x1xf32, #tpu.memory_space<vmem>>, %arg8: memref<2x128xf32, #tpu.memory_space<vmem>>) attributes {dimension_semantics = [#tpu.dimension_semantics<parallel>], iteration_bounds = array<i64: 1>, scalar_prefetch = 0 : i64, scratch_operands = 0 : i64, tpu.core_type = #tpu.core_type<tc>, window_params = [{transform_indices = @transform_0, window_bounds = array<i64: 128, 32>}, {pipeline_mode = #tpu.pipeline_mode<synchronous>, transform_indices = @transform_1, window_bounds = array<i64: 32, 128>}, {pipeline_mode = #tpu.pipeline_mode<synchronous>, transform_indices = @transform_2, window_bounds = array<i64: 1, 128>}, {pipeline_mode = #tpu.pipeline_mode<synchronous>, transform_indices = @transform_3, window_bounds = array<i64: 128, 128>}, {pipeline_mode = #tpu.pipeline_mode<synchronous>, transform_indices = @transform_4, window_bounds = array<i64: 1, 128>}, {pipeline_mode = #tpu.pipeline_mode<synchronous>, transform_indices = @transform_5, window_bounds = array<i64: 1, 128>}, {pipeline_mode = #tpu.pipeline_mode<synchronous>, transform_indices = @transform_6, window_bounds = array<i64: 1, 1>}, {transform_indices = @transform_7, window_bounds = array<i64: 2, 128>}]} {
    %c0 = arith.constant 0 : index
    %c0_0 = arith.constant 0 : index
    %0 = vector.load %arg1[%c0, %c0_0] : memref<128x32xbf16, #tpu.memory_space<vmem>>, vector<128x32xbf16>
    %c0_1 = arith.constant 0 : index
    %c0_2 = arith.constant 0 : index
    %1 = vector.load %arg2[%c0_1, %c0_2] : memref<32x128xbf16, #tpu.memory_space<vmem>>, vector<32x128xbf16>
    %cst = arith.constant dense<0.000000e+00> : vector<128x128xf32>
    %2 = tpu.matmul %0, %1, %cst {dimension_numbers = #tpu.dot_dimension_numbers<[1], [0], [0], [1], [0, 0, 1, 1], [], []>} : vector<128x32xbf16>, vector<32x128xbf16>, vector<128x128xf32> -> vector<128x128xf32>
    %c0_3 = arith.constant 0 : index
    %c0_4 = arith.constant 0 : index
    %3 = vector.load %arg3[%c0_3, %c0_4] : memref<1x128xf32, #tpu.memory_space<vmem>>, vector<1x128xf32>
    %4 = vector.broadcast %3 : vector<1x128xf32> to vector<128x128xf32>
    %5 = arith.addf %2, %4 : vector<128x128xf32>
    %cst_5 = arith.constant 0.000000e+00 : f32
    %6 = vector.broadcast %cst_5 : f32 to vector<128x128xf32>
    %7 = arith.maximumf %5, %6 : vector<128x128xf32>
    %8 = arith.truncf %7 : vector<128x128xf32> to vector<128x128xbf16>
    %c0_6 = arith.constant 0 : index
    %c0_7 = arith.constant 0 : index
    %9 = vector.load %arg4[%c0_6, %c0_7] : memref<128x128xbf16, #tpu.memory_space<vmem>>, vector<128x128xbf16>
    %cst_8 = arith.constant dense<0.000000e+00> : vector<128x128xf32>
    %10 = tpu.matmul %8, %9, %cst_8 {dimension_numbers = #tpu.dot_dimension_numbers<[1], [0], [0], [1], [0, 0, 1, 1], [], []>} : vector<128x128xbf16>, vector<128x128xbf16>, vector<128x128xf32> -> vector<128x128xf32>
    %c0_9 = arith.constant 0 : index
    %c0_10 = arith.constant 0 : index
    %11 = vector.load %arg5[%c0_9, %c0_10] : memref<1x128xf32, #tpu.memory_space<vmem>>, vector<1x128xf32>
    %12 = vector.broadcast %11 : vector<1x128xf32> to vector<128x128xf32>
    %13 = arith.addf %10, %12 : vector<128x128xf32>
    %cst_11 = arith.constant 0.000000e+00 : f32
    %14 = vector.broadcast %cst_11 : f32 to vector<128x128xf32>
    %15 = arith.maximumf %13, %14 : vector<128x128xf32>
    %c0_12 = arith.constant 0 : index
    %c0_13 = arith.constant 0 : index
    %16 = vector.load %arg6[%c0_12, %c0_13] : memref<1x128xf32, #tpu.memory_space<vmem>>, vector<1x128xf32>
    %cst_14 = arith.constant dense<0.000000e+00> : vector<1x128xf32>
    %17 = tpu.matmul %16, %15, %cst_14 {dimension_numbers = #tpu.dot_dimension_numbers<[1], [1], [0], [0], [0, 0, 1, 0], [], []>} : vector<1x128xf32>, vector<128x128xf32>, vector<1x128xf32> -> vector<1x128xf32>
    %c0_15 = arith.constant 0 : index
    %c0_16 = arith.constant 0 : index
    %18 = vector.load %arg7[%c0_15, %c0_16] : memref<1x1xf32, #tpu.memory_space<vmem>>, vector<1x1xf32>
    %19 = vector.broadcast %18 : vector<1x1xf32> to vector<1x128xf32>
    %20 = arith.addf %17, %19 : vector<1x128xf32>
    %cst_17 = arith.constant 5.000000e-01 : f32
    %21 = vector.broadcast %cst_17 : f32 to vector<1x128xf32>
    %22 = arith.mulf %21, %20 : vector<1x128xf32>
    %23 = math.tanh %22 : vector<1x128xf32>
    %cst_18 = arith.constant 1.000000e+00 : f32
    %24 = vector.broadcast %cst_18 : f32 to vector<1x128xf32>
    %25 = arith.addf %23, %24 : vector<1x128xf32>
    %cst_19 = arith.constant 5.000000e-01 : f32
    %26 = vector.broadcast %cst_19 : f32 to vector<1x128xf32>
    %27 = arith.mulf %26, %25 : vector<1x128xf32>
    %28 = tpu.concatenate %27, %20 in 0 : vector<1x128xf32>, vector<1x128xf32> -> vector<2x128xf32>
    %c0_20 = arith.constant 0 : index
    %c0_21 = arith.constant 0 : index
    %29 = vector.load %arg8[%c0_20, %c0_21] : memref<2x128xf32, #tpu.memory_space<vmem>>, vector<2x128xf32>
    tpu.vector_store %arg8[%c0_20, %c0_21], %28 {strides = array<i32>} : memref<2x128xf32, #tpu.memory_space<vmem>>, vector<2x128xf32>,
    return
  }
  func.func @transform_0(%arg0: i32) -> (i32, i32) {
    %c0_i32 = arith.constant 0 : i32
    %c0_i32_0 = arith.constant 0 : i32
    return %arg0, %c0_i32 : i32, i32
  }
  func.func @transform_1(%arg0: i32) -> (i32, i32) {
    %c0_i32 = arith.constant 0 : i32
    %c0_i32_0 = arith.constant 0 : i32
    %c0_i32_1 = arith.constant 0 : i32
    return %c0_i32, %c0_i32_0 : i32, i32
  }
  func.func @transform_2(%arg0: i32) -> (i32, i32) {
    %c0_i32 = arith.constant 0 : i32
    %c0_i32_0 = arith.constant 0 : i32
    %c0_i32_1 = arith.constant 0 : i32
    return %c0_i32, %c0_i32_0 : i32, i32
  }
  func.func @transform_3(%arg0: i32) -> (i32, i32) {
    %c0_i32 = arith.constant 0 : i32
    %c0_i32_0 = arith.constant 0 : i32
    %c0_i32_1 = arith.constant 0 : i32
    return %c0_i32, %c0_i32_0 : i32, i32
  }
  func.func @transform_4(%arg0: i32) -> (i32, i32) {
    %c0_i32 = arith.constant 0 : i32
    %c0_i32_0 = arith.constant 0 : i32
    %c0_i32_1 = arith.constant 0 : i32
    return %c0_i32, %c0_i32_0 : i32, i32
  }
  func.func @transform_5(%arg0: i32) -> (i32, i32) {
    %c0_i32 = arith.constant 0 : i32
    %c0_i32_0 = arith.constant 0 : i32
    %c0_i32_1 = arith.constant 0 : i32
    return %c0_i32, %c0_i32_0 : i32, i32
  }
  func.func @transform_6(%arg0: i32) -> (i32, i32) {
    %c0_i32 = arith.constant 0 : i32
    %c0_i32_0 = arith.constant 0 : i32
    %c0_i32_1 = arith.constant 0 : i32
    return %c0_i32, %c0_i32_0 : i32, i32
  }
  func.func @transform_7(%arg0: i32) -> (i32, i32) {
    %c0_i32 = arith.constant 0 : i32
    %c0_i32_0 = arith.constant 0 : i32
    return %c0_i32, %arg0 : i32, i32
  }
}

</mosaic_0001>

<bundles_post_ra>
// kernel: tpu_custom_call.1
= control target key start
LH: loop header
LB: loop body
LE: loop exit
PB: predicated region body
PF: predicated region fallthrough
CT: control target
= control target key end

     0   :  { %s1037_s0 = inlined_call_operand.hbm [shape: bf16[16,32], index: 0, kind: input, shape index: {}]   ;;  %s1038_s1 = inlined_call_operand.hbm [shape: bf16[32,128], index: 1, kind: input, shape index: {}]   ;;  %s1039_s2 = inlined_call_operand.vmem [shape: f32[1,128], index: 2, kind: input, shape index: {}]   ;;  %s1040_s3 = inlined_call_operand.hbm [shape: bf16[128,128], index: 3, kind: input, shape index: {}]   ;;  %s1041_s4 = inlined_call_operand.vmem [shape: f32[1,128], index: 4, kind: input, shape index: {}]   ;;  %s1042_s5 = inlined_call_operand.vmem [shape: f32[1,128], index: 5, kind: input, shape index: {}]   ;;  %s1043_s6 = inlined_call_operand.<no memory space> [shape: f32[1,1], index: 6, kind: input, shape index: {}]   ;;  %s1044_s7 = inlined_call_operand.hbm [shape: f32[2,128], index: 7, kind: output, shape index: {}]  }
   0x1   :  { %v12_v0 = vstv %s1043_s6 }
   0x2   :  { %13 = vst [vmem:[#allocation2] sm:$0x1] %v12_v0 }
   0x3   :  { %14 = vsyncpa [#allocation4], 0 }
   0x4   :  { %15 = vsyncpa [#allocation7], 0 }
   0x5   :  { %16 = vsyncpa [#allocation5], 0 }
   0x6   :  { %21 = vsyncadd [#allocation4], 896  ;;  %s894_s26 = smov [#allocation6]   ;;  %s895_s28 = smov [#allocation3]  }
   0x7   :  { %s34_s27 = sshll.u32 %s894_s26, 4  ;;  %s22_s29 = sshll.u32 %s895_s28, 4  ;;  %s35_s27 = int_to_ptr.vmem [resolvable:$true] %s34_s27  ;;  %s947_s29 = int_to_ptr.vmem [resolvable:$true] %s22_s29 }
   0x8   :  { %s800_s9 = scalar_lea.hbm %s1038_s1, 256 }
   0x9   :  { %p801_p0 = scmp.ne.s32.totalorder %s1038_s1, %s800_s9  ;;  %p804_p1 = scmp.lt.u32.totalorder %s800_s9, %s1038_s1 }
   0xb   :  { %p806_p2 = pnand %p804_p1, %p801_p0 }
   0xd   :  { %809 = shalt.err (!%p806_p2)
}
   0xe   :  { %s810_s13 = scalar_lea.vmem %s35_s27, 256  ;;  %p815_p4 = scmp.lt.s32.totalorder %s35_s27, %s35_s27 }
   0xf   :  { %p811_p3 = scmp.ne.s32.totalorder %s35_s27, %s810_s13  ;;  %p816_p5 = scmp.lt.s32.totalorder %s810_s13, %s810_s13 }
  0x11   :  { %p817_p6 = por %p816_p5, %p815_p4 }
  0x13   :  { %p818_p7 = pnand %p817_p6, %p811_p3 }
  0x15   :  { %821 = shalt.err (!%p818_p7)
}
  0x16   :  { %s896_s14 = smov 64   ;;  %s897_s15 = smov 4  }
  0x17   :  { %40 = dma.hbm_to_vmem [thread:$0]  %s1038_s1, 256, %s35_s27, [#allocation7], %s896_s14, %s896_s14, %s897_s15  }
  0x18   :  { %s822_s20 = scalar_lea.hbm %s1037_s0, 128 }
  0x19   :  { %p823_p8 = scmp.ne.s32.totalorder %s1037_s0, %s822_s20  ;;  %p826_p9 = scmp.lt.u32.totalorder %s822_s20, %s1037_s0 }
  0x1b   :  { %p828_p10 = pnand %p826_p9, %p823_p8 }
  0x1d   :  { %831 = shalt.err (!%p828_p10)
}
  0x1e   :  { %s832_s25 = scalar_lea.vmem %s947_s29, 128  ;;  %s836_s1 = scalar_lea.vmem %s947_s29, 1024 }
  0x1f   :  { %p833_p11 = scmp.ne.s32.totalorder %s947_s29, %s832_s25  ;;  %p837_p12 = scmp.lt.s32.totalorder %s947_s29, %s947_s29 }
  0x20   :  { %p838_p13 = scmp.lt.s32.totalorder %s836_s1, %s832_s25 }
  0x22   :  { %p839_p0 = por %p838_p13, %p837_p12 }
  0x24   :  { %p840_p1 = pnand %p839_p0, %p833_p11 }
  0x26   :  { %843 = shalt.err (!%p840_p1)
}
  0x27   :  { %28 = dma.hbm_to_vmem [thread:$0]  %s1037_s0, 128, %s947_s29, [#allocation4], %s896_s14, %s896_s14, %s897_s15  }
  0x28   :  { %s898_s28 = smov [#allocation8]   ;;  %s844_s10 = scalar_lea.hbm %s1040_s3, 1024 }
  0x29   :  { %s48_s30 = sshll.u32 %s898_s28, 4  ;;  %p845_p2 = scmp.ne.s32.totalorder %s1040_s3, %s844_s10  ;;  %s49_s30 = int_to_ptr.vmem [resolvable:$true] %s48_s30 }
  0x2a   :  { %p848_p3 = scmp.lt.u32.totalorder %s844_s10, %s1040_s3 }
  0x2c   :  { %p850_p4 = pnand %p848_p3, %p845_p2 }
  0x2e   :  { %853 = shalt.err (!%p850_p4)
}
  0x2f   :  { %s854_s16 = scalar_lea.vmem %s49_s30, 1024  ;;  %p859_p6 = scmp.lt.s32.totalorder %s49_s30, %s49_s30 }
  0x30   :  { %p855_p5 = scmp.ne.s32.totalorder %s49_s30, %s854_s16  ;;  %p860_p7 = scmp.lt.s32.totalorder %s854_s16, %s854_s16 }
  0x32   :  { %p861_p8 = por %p860_p7, %p859_p6 }
  0x34   :  { %p862_p9 = pnand %p861_p8, %p855_p5 }
  0x36   :  { %865 = shalt.err (!%p862_p9)
}
  0x37   :  { %54 = dma.hbm_to_vmem [thread:$0]  %s1040_s3, 1024, %s49_s30, [#allocation7], %s896_s14, %s896_s14, %s897_s15  }
  0x38   :  { %888 = dma.done.wait [#allocation4], 1024  }
  0x39   :  { %889 = vsyncadd [#allocation4], 4294966272 }
  0x3a   :  { %890 = dma.done.wait [#allocation7], 1280  }
  0x3b   :  { %891 = vsyncadd [#allocation7], 4294966016  ;;  %v780_v1 = vld [vmem:[#allocation6] sm:$0xff]   ;;  %v781_v2 = vld [vmem:[#allocation6 + $0x8] sm:$0xff]   ;;  %vm150_vm0 = vcmask 261120   ;;  %vm900_vm1 = vmmov 0  }
  0x3c   :  { %658 = vmatprep.subr.bf16.mxu1 %v780_v1  ;;  %v782_v3 = vld [vmem:[#allocation3] sm:$0xff]   ;;  %v783_v4 = vld [vmem:[#allocation3 + $0x8] sm:$0xff]   ;;  %v784_v5 = vld [vmem:[#allocation3 + $0x10] sm:$0xff]   ;;  %s903_s18 = smov [#allocation9]   ;;  %vm568_vm2 = vcmask 1040384  }
  0x3d   :  { %659 = vmatpush3.bf16.msra.mxu1 %v780_v1  ;;  %662 = vmatprep.mubr.msk.bf16.mxu1 %vm150_vm0, %v782_v3  ;;  %v790_v6 = vld [vmem:[#allocation8] sm:$0xff]   ;;  %v791_v7 = vld [vmem:[#allocation8 + $0x8] sm:$0xff]   ;;  %v792_v9 = vld [vmem:[#allocation8 + $0x10] sm:$0xff]   ;;  %s577_s19 = sshll.u32 %s903_s18, 4  ;;  %s578_s19 = int_to_ptr.vmem [resolvable:$true] %s577_s19 }
  0x3e   :  { %660 = vmatprep.subr.bf16.mxu1 %v781_v2  ;;  %v785_v8 = vld [vmem:[#allocation3 + $0x18] sm:$0xff]   ;;  %v786_v10 = vld [vmem:[#allocation3 + $0x20] sm:$0xff]   ;;  %v793_v11 = vld [vmem:[#allocation8 + $0x18] sm:$0xff]   ;;  %p871_p11 = scmp.lt.s32.totalorder %s578_s19, %s578_s19 }
  0x3f   :  { %v787_v12 = vld [vmem:[#allocation3 + $0x28] sm:$0xff]   ;;  %v794_v13 = vld [vmem:[#allocation8 + $0x20] sm:$0xff]   ;;  %v795_v15 = vld [vmem:[#allocation8 + $0x28] sm:$0xff]  }
  0x40   :  { %v788_v14 = vld [vmem:[#allocation3 + $0x30] sm:$0xff]   ;;  %v789_v16 = vld [vmem:[#allocation3 + $0x38] sm:$0xff]   ;;  %v796_v17 = vld [vmem:[#allocation8 + $0x30] sm:$0xff]  }
  0x41   :  { %661 = vmatpush3.bf16.msra.mxu1 %v781_v2  ;;  %v797_v18 = vld [vmem:[#allocation8 + $0x38] sm:$0xff]   ;;  %v587_v19 = vld [vmem:[%s1039_s2] ss:$0 sm:$0xff] }
  0x42   :  { %678 = vmatprep.subr.bf16.mxu1 %v790_v6 }
  0x44   :  { %663 = vmatmul.mubr.msk.bf16.vlgmr.msra.gmra.mrb[0].mxu1 %vm150_vm0, %v783_v4 }
  0x45   :  { %666 = vmatprep.mubr.msk.bf16.mxu1 %vm150_vm0, %v784_v5  ;;  %679 = vmatpush3.bf16.msra.mxu1 %v790_v6 }
  0x46   :  { %680 = vmatprep.subr.bf16.mxu1 %v791_v7 }
  0x49   :  { %681 = vmatpush3.bf16.msra.mxu1 %v791_v7 }
  0x4a   :  { %682 = vmatprep.subr.bf16.mxu1 %v792_v9 }
  0x4c   :  { %667 = vmatmul.mubr.msk.bf16.gmra.mrb[4].mxu1 %vm150_vm0, %v785_v8 }
  0x4d   :  { %670 = vmatprep.mubr.msk.bf16.mxu1 %vm150_vm0, %v786_v10  ;;  %683 = vmatpush3.bf16.msra.mxu1 %v792_v9 }
  0x4e   :  { %684 = vmatprep.subr.bf16.mxu1 %v793_v11 }
  0x51   :  { %685 = vmatpush3.bf16.msra.mxu1 %v793_v11 }
  0x52   :  { %686 = vmatprep.subr.bf16.mxu1 %v794_v13 }
  0x54   :  { %671 = vmatmul.mubr.msk.bf16.gmra.mrb[8].mxu1 %vm150_vm0, %v787_v12  ;;  %v899_v12 = vmov 0.0|0.0  }
  0x55   :  { %674 = vmatprep.mubr.msk.bf16.mxu1 %vm150_vm0, %v788_v14  ;;  %687 = vmatpush3.bf16.msra.mxu1 %v794_v13  ;;  %v901_v13 = vmov 0.0   ;;  %v481_v14 = vld [vmem:[#allocation2] sm:$0x1] }
  0x56   :  { %688 = vmatprep.subr.bf16.mxu1 %v795_v15  ;;  %745 = vmatprep.subr.bf16.mxu0 %v899_v12 }
  0x57   :  { %742 = vmatprep.mubr.msk.f32.mxu0 %vm900_vm1, %v901_v13 }
  0x59   :  { %689 = vmatpush3.bf16.msra.mxu1 %v795_v15  ;;  %v902_v15 = vmov 0  }
  0x5a   :  { %690 = vmatprep.subr.bf16.mxu1 %v796_v17  ;;  %779 = vset.pattern.permute.xlu0 %v902_v15 }
  0x5b   :  { %484 = vperm.xlu0 %779, %v481_v14  }
  0x5c   :  { %675 = vmatmul.mubr.msk.bf16.gmra.mrb[12].mxu1 %vm150_vm0, %v789_v16  ;;  %v606_v16 = vld [vmem:[%s1041_s4] ss:$0 sm:$0xff] }
  0x5d   :  { %691 = vmatpush3.bf16.msra.mxu1 %v796_v17 }
  0x5e   :  { %692 = vmatprep.subr.bf16.mxu1 %v797_v18 }
  0x61   :  { %693 = vmatpush3.bf16.msra.mxu1 %v797_v18 }
  0xda   :  { %v485_v14 = vpop.permute.xlu0 %484 }
 0x117   :  { %v664_v20 = vpop.f32.mrb[0].mxu1 }
 0x118   :  { %v218_v21 = vadd.f32 %v664_v20, %v587_v19  ;;  %v209_v22 = vpop.f32.mrb[1].mxu1 }
 0x119   :  { %v210_v23 = vadd.f32 %v587_v19, %v209_v22  ;;  %v665_v24 = vpop.f32.mrb[2].mxu1 }
 0x11a   :  { %v221_v25 = vadd.f32 %v665_v24, %v587_v19  ;;  %v212_v26 = vpop.f32.mrb[3].mxu1  ;;  %v274_v28 = vmax.f32 %v218_v21, 0.0 }
 0x11b   :  { %v213_v27 = vadd.f32 %v587_v19, %v212_v26  ;;  %v272_v30 = vmax.f32 %v210_v23, 0.0 }
 0x11c   :  { %v275_v29 = vmax.f32 %v221_v25, 0.0 }
 0x11d   :  { %v273_v31 = vmax.f32 %v213_v27, 0.0 }
 0x11e   :  { %v289_v32 = vpack.c.bf16 %v275_v29, %v274_v28 }
 0x11f   :  { %v288_v33 = vpack.c.bf16 %v273_v31, %v272_v30  ;;  %v668_v34 = vpop.f32.mrb[4].mxu1 }
 0x120   :  { %v234_v35 = vadd.f32 %v668_v34, %v587_v19  ;;  %v225_v36 = vpop.f32.mrb[5].mxu1 }
 0x121   :  { %v226_v37 = vadd.f32 %v587_v19, %v225_v36  ;;  %694 = vmatprep.mubr.bf16.mxu1 %v288_v33  ;;  %v669_v38 = vpop.f32.mrb[6].mxu1 }
 0x122   :  { %v278_v39 = vmax.f32 %v234_v35, 0.0  ;;  %v237_v40 = vadd.f32 %v669_v38, %v587_v19  ;;  %695 = vmatmul.mubr.bf16.vlgmr.msra.gmra.mrb[16].mxu1 %v289_v32  ;;  %v228_v41 = vpop.f32.mrb[7].mxu1 }
 0x123   :  { %v276_v42 = vmax.f32 %v226_v37, 0.0  ;;  %v229_v43 = vadd.f32 %v587_v19, %v228_v41 }
 0x124   :  { %v279_v44 = vmax.f32 %v237_v40, 0.0 }
 0x125   :  { %v277_v45 = vmax.f32 %v229_v43, 0.0 }
 0x126   :  { %v291_v46 = vpack.c.bf16 %v279_v44, %v278_v39 }
 0x127   :  { %v290_v47 = vpack.c.bf16 %v277_v45, %v276_v42  ;;  %v672_v48 = vpop.f32.mrb[8].mxu1 }
 0x128   :  { %v250_v49 = vadd.f32 %v672_v48, %v587_v19  ;;  %v241_v50 = vpop.f32.mrb[9].mxu1 }
 0x129   :  { %698 = vmatprep.mubr.bf16.mxu1 %v290_v47  ;;  %v242_v51 = vadd.f32 %v587_v19, %v241_v50  ;;  %v673_v52 = vpop.f32.mrb[10].mxu1 }
 0x12a   :  { %699 = vmatmul.mubr.bf16.gmra.mrb[20].mxu1 %v291_v46  ;;  %v282_v53 = vmax.f32 %v250_v49, 0.0  ;;  %v253_v54 = vadd.f32 %v673_v52, %v587_v19  ;;  %v244_v55 = vpop.f32.mrb[11].mxu1 }
 0x12b   :  { %v280_v56 = vmax.f32 %v242_v51, 0.0  ;;  %v245_v57 = vadd.f32 %v587_v19, %v244_v55 }
 0x12c   :  { %v283_v58 = vmax.f32 %v253_v54, 0.0 }
 0x12d   :  { %v281_v59 = vmax.f32 %v245_v57, 0.0 }
 0x12e   :  { %v293_v60 = vpack.c.bf16 %v283_v58, %v282_v53 }
 0x12f   :  { %v292_v61 = vpack.c.bf16 %v281_v59, %v280_v56  ;;  %v676_v62 = vpop.f32.mrb[12].mxu1 }
 0x130   :  { %v266_v63 = vadd.f32 %v676_v62, %v587_v19  ;;  %v257_v0 = vpop.f32.mrb[13].mxu1 }
 0x131   :  { %702 = vmatprep.mubr.bf16.mxu1 %v292_v61  ;;  %v258_v1 = vadd.f32 %v587_v19, %v257_v0  ;;  %v677_v2 = vpop.f32.mrb[14].mxu1 }
 0x132   :  { %703 = vmatmul.mubr.bf16.gmra.mrb[24].mxu1 %v293_v60  ;;  %v286_v3 = vmax.f32 %v266_v63, 0.0  ;;  %v269_v4 = vadd.f32 %v677_v2, %v587_v19  ;;  %v260_v5 = vpop.f32.mrb[15].mxu1 }
 0x133   :  { %v284_v6 = vmax.f32 %v258_v1, 0.0  ;;  %v261_v7 = vadd.f32 %v587_v19, %v260_v5 }
 0x134   :  { %v287_v8 = vmax.f32 %v269_v4, 0.0 }
 0x135   :  { %v285_v9 = vmax.f32 %v261_v7, 0.0 }
 0x136   :  { %v295_v10 = vpack.c.bf16 %v287_v8, %v286_v3 }
 0x137   :  { %v294_v11 = vpack.c.bf16 %v285_v9, %v284_v6  ;;  %v480_v9 = vld [vmem:[%s1042_s5] sm:$0x1]  ;;  %s866_s5 = scalar_lea.vmem %s578_s19, 32 }
 0x138   :  { %p867_p10 = scmp.ne.s32.totalorder %s578_s19, %s866_s5  ;;  %p872_p12 = scmp.lt.s32.totalorder %s866_s5, %s866_s5 }
 0x139   :  { %706 = vmatprep.mubr.bf16.mxu1 %v294_v11 }
 0x13a   :  { %707 = vmatmul.mubr.bf16.gmra.mrb[28].mxu1 %v295_v10  ;;  %v487_v10 = vlaneseq  ;;  %p873_p13 = por %p872_p12, %p871_p11 }
 0x13c   :  { %v488_v11 = vshrl.u32 %v487_v10, 7  ;;  %p874_p0 = pnand %p873_p13, %p867_p10 }
 0x13e   :  { %v489_v13 = vsub.s32 0, %v488_v11 }
 0x140   :  { %v490_v15 = vrot.slane %v485_v14, %v489_v13 }
 0x1f5   :  { %v696_v17 = vpop.f32.mrb[16].mxu1 }
 0x1f6   :  { %v410_v18 = vadd.f32 %v696_v17, %v606_v16  ;;  %v401_v19 = vpop.f32.mrb[17].mxu1 }
 0x1f7   :  { %v402_v20 = vadd.f32 %v606_v16, %v401_v19  ;;  %v697_v21 = vpop.f32.mrb[18].mxu1 }
 0x1f8   :  { %v413_v22 = vadd.f32 %v697_v21, %v606_v16  ;;  %v404_v23 = vpop.f32.mrb[19].mxu1  ;;  %v466_v25 = vmax.f32 %v410_v18, 0.0 }
 0x1f9   :  { %v405_v24 = vadd.f32 %v606_v16, %v404_v23  ;;  %v464_v27 = vmax.f32 %v402_v20, 0.0 }
 0x1fa   :  { %v467_v26 = vmax.f32 %v413_v22, 0.0 }
 0x1fb   :  { %v465_v28 = vmax.f32 %v405_v24, 0.0 }
 0x1fc   :  { %v749_v29 = vpack.c.bf16 %v467_v26, %v466_v25 }
 0x1fd   :  { %v700_v30 = vpop.f32.mrb[20].mxu1  ;;  %v746_v31 = vpack.c.bf16 %v465_v28, %v464_v27 }
 0x1fe   :  { %v426_v32 = vadd.f32 %v700_v30, %v606_v16  ;;  %v417_v33 = vpop.f32.mrb[21].mxu1 }
 0x1ff   :  { %v418_v34 = vadd.f32 %v606_v16, %v417_v33  ;;  %747 = vmatpush3.bf16.xpose.msra.mxu0 %v746_v31  ;;  %v701_v35 = vpop.f32.mrb[22].mxu1 }
 0x200   :  { %v470_v36 = vmax.f32 %v426_v32, 0.0  ;;  %v429_v37 = vadd.f32 %v701_v35, %v606_v16  ;;  %v420_v38 = vpop.f32.mrb[23].mxu1  ;;  %748 = vmatprep.subr.bf16.mxu0 %v899_v12 }
 0x201   :  { %v468_v39 = vmax.f32 %v418_v34, 0.0  ;;  %v421_v40 = vadd.f32 %v606_v16, %v420_v38 }
 0x202   :  { %v471_v41 = vmax.f32 %v429_v37, 0.0 }
 0x203   :  { %v469_v42 = vmax.f32 %v421_v40, 0.0 }
 0x204   :  { %v755_v43 = vpack.c.bf16 %v471_v41, %v470_v36 }
 0x205   :  { %v752_v44 = vpack.c.bf16 %v469_v42, %v468_v39  ;;  %v704_v45 = vpop.f32.mrb[24].mxu1 }
 0x206   :  { %v442_v46 = vadd.f32 %v704_v45, %v606_v16  ;;  %v433_v47 = vpop.f32.mrb[25].mxu1 }
 0x207   :  { %750 = vmatpush3.bf16.xpose.msra.mxu0 %v749_v29  ;;  %v434_v48 = vadd.f32 %v606_v16, %v433_v47  ;;  %v705_v49 = vpop.f32.mrb[26].mxu1 }
 0x208   :  { %v474_v50 = vmax.f32 %v442_v46, 0.0  ;;  %751 = vmatprep.subr.bf16.mxu0 %v899_v12  ;;  %v445_v51 = vadd.f32 %v705_v49, %v606_v16  ;;  %v436_v52 = vpop.f32.mrb[27].mxu1 }
 0x209   :  { %v472_v53 = vmax.f32 %v434_v48, 0.0  ;;  %v437_v54 = vadd.f32 %v606_v16, %v436_v52 }
 0x20a   :  { %v475_v55 = vmax.f32 %v445_v51, 0.0 }
 0x20b   :  { %v473_v56 = vmax.f32 %v437_v54, 0.0 }
 0x20c   :  { %v761_v57 = vpack.c.bf16 %v475_v55, %v474_v50 }
 0x20d   :  { %v758_v58 = vpack.c.bf16 %v473_v56, %v472_v53  ;;  %v708_v59 = vpop.f32.mrb[28].mxu1 }
 0x20e   :  { %v458_v60 = vadd.f32 %v708_v59, %v606_v16  ;;  %v449_v61 = vpop.f32.mrb[29].mxu1 }
 0x20f   :  { %753 = vmatpush3.bf16.xpose.msra.mxu0 %v752_v44  ;;  %v450_v62 = vadd.f32 %v606_v16, %v449_v61  ;;  %v709_v63 = vpop.f32.mrb[30].mxu1 }
 0x210   :  { %754 = vmatprep.subr.bf16.mxu0 %v899_v12  ;;  %v478_v0 = vmax.f32 %v458_v60, 0.0  ;;  %v461_v1 = vadd.f32 %v709_v63, %v606_v16  ;;  %v452_v2 = vpop.f32.mrb[31].mxu1 }
 0x211   :  { %v476_v3 = vmax.f32 %v450_v62, 0.0  ;;  %v453_v4 = vadd.f32 %v606_v16, %v452_v2 }
 0x212   :  { %v479_v5 = vmax.f32 %v461_v1, 0.0 }
 0x213   :  { %v477_v6 = vmax.f32 %v453_v4, 0.0 }
 0x214   :  { %v767_v7 = vpack.c.bf16 %v479_v5, %v478_v0 }
 0x215   :  { %v764_v8 = vpack.c.bf16 %v477_v6, %v476_v3 }
 0x217   :  { %756 = vmatpush3.bf16.xpose.msra.mxu0 %v755_v43 }
 0x218   :  { %757 = vmatprep.subr.bf16.mxu0 %v899_v12 }
 0x21f   :  { %759 = vmatpush3.bf16.xpose.msra.mxu0 %v758_v58 }
 0x220   :  { %760 = vmatprep.subr.bf16.mxu0 %v899_v12 }
 0x227   :  { %762 = vmatpush3.bf16.xpose.msra.mxu0 %v761_v57 }
 0x228   :  { %763 = vmatprep.subr.bf16.mxu0 %v899_v12 }
 0x22f   :  { %765 = vmatpush3.bf16.xpose.msra.mxu0 %v764_v8 }
 0x230   :  { %766 = vmatprep.subr.bf16.mxu0 %v899_v12 }
 0x237   :  { %768 = vmatpush3.bf16.xpose.msra.mxu0 %v767_v7 }
 0x23e   :  { %743 = vmatmul.mubr.f32.vlgmr.msra.gmra.mrb[0].mxu0 %v480_v9 }
 0x311   :  { %v557_v16 = vpop.f32.mrb[0].mxu0 }
 0x312   :  { %v558_v17 = vadd.f32 %v557_v16, %v490_v15  ;;  %v744_v18 = vpop.f32.mrb[1].mxu0 }
 0x314   :  { %v561_v19 = vmul.f32 0.5, %v558_v17  ;;  %v566_v22 = vrot.slane %v558_v17, 7 }
 0x316   :  { %798 = vtanh.f32 %v561_v19 }
 0x320   :  { %v799_v20 = vpop.eup %798 }
 0x321   :  { %v563_v21 = vadd.f32 1.0, %v799_v20 }
 0x323   :  { %v564_v12 = vmul.f32 0.5, %v563_v21 }
 0x325   :  { %v569_v23 = vsel %vm568_vm2, %v564_v12, %v566_v22 }
 0x326   :  { %570 = vst [vmem:[#allocation9] sm:$0x3] %v569_v23 }
 0x327   :  { %877 = shalt.err (!%p874_p0)
}
 0x328   :  { %s878_s22 = scalar_lea.hbm %s1044_s7, 32 }
 0x329   :  { %p879_p1 = scmp.ne.s32.totalorder %s1044_s7, %s878_s22  ;;  %p882_p2 = scmp.lt.u32.totalorder %s878_s22, %s1044_s7 }
 0x32b   :  { %p884_p3 = pnand %p882_p2, %p879_p1 }
 0x32d   :  { %887 = shalt.err (!%p884_p3)
}
 0x32e   :  { %580 = dma.vmem_to_hbm [thread:$0]  %s578_s19, 32, %s1044_s7, [#allocation5]  }
 0x32f   :  { %892 = dma.done.wait [#allocation5], 32  }
 0x330   :  { %893 = vsyncadd [#allocation5], 4294967264 }
 0x331   :  { %584 = vsyncpa [#allocation4], 1 }
 0x332   :  { %585 = vsyncpa [#allocation7], 1 }
 0x333   :  { %586 = vsyncpa [#allocation5], 1 }

</bundles_post_ra>
